<compile_context>
chip_gen: v7x
topology: tpu7x:2x2x1
jax: 0.10.0
libtpu: 0.0.40
codegen_flags: <defaults>
</compile_context>

<pallas_src>
import functools

import numpy as np
import jax
import jax.numpy as jnp
from jax.experimental import pallas as pl
from jax.experimental.pallas import tpu as pltpu


def _round_up(x, m):
    return (x + m - 1) // m * m


def _pick_tile(target, padded, align):
    """Largest multiple of `align` <= min(target, padded) that divides `padded`."""
    assert padded % align == 0 and padded >= align
    t = max(align, min(target, padded))
    t = (t // align) * align
    while padded % t:
        t -= align
    return t


def _vmem_budget_bytes():
    """~85% of per-core VMEM (v5e/v6e: 128 MiB -> ~108 MiB, v7x: 64 MiB -> ~54 MiB)."""
    cap = 64 * 1024 * 1024
    try:
        cap = pltpu.get_tpu_info().vmem_capacity_bytes
    except Exception:
        pass
    return int(cap * 0.85)


# ---------------------------------------------------------------------------
# kernel 1:  h = X @ W        (computed once; row-tiled, full Fin contraction)
# ---------------------------------------------------------------------------
def _xw_kernel(x_ref, w_ref, h_ref):
    h = jnp.dot(x_ref[...], w_ref[...], preferred_element_type=jnp.float32)
    h_ref[...] = h.astype(h_ref.dtype)


# ---------------------------------------------------------------------------
# kernel 2:  out = adj @ h + bias over a flattened schedule of non-zero
# (row-tile, k-tile) adjacency tiles (block-sparse spmm, f32 accumulator).
# ---------------------------------------------------------------------------
def _spmm_kernel(rows_ref, cols_ref, firsts_ref, lasts_ref,
                 adj_ref, h_ref, b_ref, out_ref, acc_ref, *, tk, resident_h):
    t = pl.program_id(0)

    @pl.when(firsts_ref[t] == 1)
    def _():
        acc_ref[...] = jnp.zeros_like(acc_ref)

    if resident_h:
        # h is a single resident (Np, Fp) VMEM block; slice the k-tile here.
        k_off = pl.multiple_of(cols_ref[t] * tk, 128)
        h_tile = h_ref[pl.ds(k_off, tk), :]
    else:
        h_tile = h_ref[...]

    acc_ref[...] += jnp.dot(adj_ref[...], h_tile,
                            preferred_element_type=jnp.float32)

    @pl.when(lasts_ref[t] == 1)
    def _():
        out_ref[...] = (acc_ref[...] + b_ref[...]).astype(out_ref.dtype)


# ---------------------------------------------------------------------------
# host-side tile schedule (block-sparse skip of all-zero adjacency tiles)
# ---------------------------------------------------------------------------
def _tile_nonzero_mask(adj, Np, tm, tk):
    """Boolean [Np//tm, Np//tk] map of adjacency tiles containing any edge."""
    try:
        a = np.asarray(jax.device_get(adj))
    except Exception:          # traced adjacency (under jit): fall back to dense
        return None
    n = a.shape[0]
    A = np.zeros((Np, Np), dtype=bool)
    A[:n, :n] = a != 0
    return A.reshape(Np // tm, tm, Np // tk, tk).any(axis=(1, 3))


def _build_schedule(nz, n_row, n_col):
    """Flatten non-zero tiles, grouped by output-row tile (grouped-matmul style)."""
    rows, cols, firsts, lasts = [], [], [], []
    for i in range(n_row):
        if nz is None:
            ks = list(range(n_col))
        else:
            ks = [int(k) for k in np.nonzero(nz[i])[0]]
            if not ks:           # fully empty row tile: visit one tile so the
                ks = [0]         # (bias-only) output row still gets written
        for j, k in enumerate(ks):
            rows.append(i)
            cols.append(k)
            firsts.append(int(j == 0))
            lasts.append(int(j == len(ks) - 1))
    to_dev = lambda v: jnp.asarray(np.asarray(v, np.int32))
    return to_dev(rows), to_dev(cols), to_dev(firsts), to_dev(lasts)


# ---------------------------------------------------------------------------
# wrapper
# ---------------------------------------------------------------------------
def graph_conv_forward(x, w, bias, adj, *, block_m=512, block_k=None,
                       compute_dtype=jnp.bfloat16, block_sparse=True):
    """out = adj @ (x @ w) + bias  (GraphConv.forward).

    `compute_dtype` is the MXU-operand / adjacency-streaming dtype (bf16 by
    default; pass jnp.float32 for bit-faithful f32 matmuls).  Accumulation,
    bias add and the output are float32.
    """
    N, Fin = x.shape
    Fout = w.shape[1]
    assert adj.shape == (N, N)
    if bias is None:
        bias = jnp.zeros((1, Fout), jnp.float32)

    cdt_bytes = jnp.dtype(compute_dtype).itemsize
    Fp = _round_up(Fout, 128)                 # lane-dense h / acc / out
    Np = _round_up(N, 128)

    budget = _vmem_budget_bytes()
    if block_k is None:
        block_k = 4096 if budget > 80 * 1024 * 1024 else 2048

    tm = _pick_tile(block_m, Np, 16)          # 16 = bf16 sublane multiple
    tk = _pick_tile(block_k, Np, 128)

    # Keep h fully resident in VMEM when it comfortably fits the budget.
    resident_h = 2 * Np * Fp * cdt_bytes <= budget // 2

    def usage(tm_, tk_):
        adj_b = 2 * tm_ * tk_ * cdt_bytes                         # double-buffered
        h_b = 2 * (Np * Fp if resident_h else tk_ * Fp) * cdt_bytes
        return adj_b + h_b + 2 * Fp * 4 + 2 * tm_ * Fp * 4 + tm_ * Fp * 4

    while usage(tm, tk) > budget and tk > 128:
        tk = _pick_tile(tk // 2, Np, 128)
    while usage(tm, tk) > budget and tm > 16:
        tm = _pick_tile(tm // 2, Np, 16)

    n_row, n_col = Np // tm, Np // tk

    # Pad/cast inputs.  The adjacency pad+cast is only done when needed: it is
    # a full extra N^2 HBM pass, so large-graph callers should pass a
    # pre-padded compute_dtype adjacency and skip it entirely.
    xp = jnp.pad(x, ((0, Np - N), (0, 0))).astype(compute_dtype)
    wp = jnp.pad(w, ((0, 0), (0, Fp - Fout))).astype(compute_dtype)
    bp = jnp.pad(jnp.reshape(bias, (1, Fout)).astype(jnp.float32),
                 ((0, 0), (0, Fp - Fout)))
    adjp = adj
    if adjp.shape != (Np, Np):
        adjp = jnp.pad(adjp, ((0, Np - N), (0, Np - N)))
    if adjp.dtype != compute_dtype:
        adjp = adjp.astype(compute_dtype)

    # --- h = X @ W, hoisted out of the adjacency loop (computed once) -------
    h = pl.pallas_call(
        _xw_kernel,
        out_shape=jax.ShapeDtypeStruct((Np, Fp), compute_dtype),
        grid=(n_row,),
        in_specs=[
            pl.BlockSpec((tm, Fin), lambda i: (i, 0)),
            pl.BlockSpec((Fin, Fp), lambda i: (0, 0)),
        ],
        out_specs=pl.BlockSpec((tm, Fp), lambda i: (i, 0)),
        compiler_params=pltpu.CompilerParams(
            dimension_semantics=("parallel",),
            vmem_limit_bytes=budget),
    )(xp, wp)

    # --- block-sparse schedule over non-empty adjacency tiles ----------------
    nz = _tile_nonzero_mask(adj, Np, tm, tk) if block_sparse else None
    rows, cols, firsts, lasts = _build_schedule(nz, n_row, n_col)
    n_steps = int(rows.shape[0])

    if resident_h:
        h_spec = pl.BlockSpec((Np, Fp), lambda t, r, c, f, l: (0, 0))
    else:
        h_spec = pl.BlockSpec((tk, Fp), lambda t, r, c, f, l: (c[t], 0))

    # --- out = adj @ h + bias, tiles visited via the prefetched schedule -----
    out = pl.pallas_call(
        functools.partial(_spmm_kernel, tk=tk, resident_h=resident_h),
        out_shape=jax.ShapeDtypeStruct((Np, Fp), jnp.float32),
        grid_spec=pltpu.PrefetchScalarGridSpec(
            num_scalar_prefetch=4,
            grid=(n_steps,),
            in_specs=[
                pl.BlockSpec((tm, tk), lambda t, r, c, f, l: (r[t], c[t])),
                h_spec,
                pl.BlockSpec((1, Fp), lambda t, r, c, f, l: (0, 0)),
            ],
            out_specs=pl.BlockSpec((tm, Fp), lambda t, r, c, f, l: (r[t], 0)),
            scratch_shapes=[pltpu.VMEM((tm, Fp), jnp.float32)]),
        compiler_params=pltpu.CompilerParams(
            dimension_semantics=("arbitrary",),
            vmem_limit_bytes=budget),
    )(rows, cols, firsts, lasts, adjp, h, bp)

    return out[:N, :Fout]


if __name__ == "__main__":
    key = jax.random.PRNGKey(0)
    N, Fin, Fout = 300, 32, 48          # small, deliberately not 128-aligned
    k_w, k_b, k_x, k_e = jax.random.split(key, 4)

    # GraphConv.reset_parameters(): uniform(-stdv, stdv), stdv = 1/sqrt(out_features)
    stdv = 1.0 / np.sqrt(Fout)
    W = jax.random.uniform(k_w, (Fin, Fout), jnp.float32, -stdv, stdv)
    b = jax.random.uniform(k_b, (1, Fout), jnp.float32, -stdv, stdv)
    x = jax.random.normal(k_x, (N, Fin), dtype=jnp.float32)

    # synthetic symmetric graph with self-loops, row-normalized (dense stand-in
    # for the torch.sparse adjacency handed to torch.spmm)
    r = jax.random.uniform(k_e, (N, N))
    a = (r < 0.1).astype(jnp.float32)
    a = jnp.maximum(jnp.maximum(a, a.T), jnp.eye(N, dtype=jnp.float32))
    adj = a / jnp.sum(a, axis=1, keepdims=True)

    # small tiles on purpose so the demo exercises multi-tile accumulation
    out = jax.block_until_ready(
        graph_conv_forward(x, W, b, adj, block_m=128, block_k=128))

    # float32 reference of GraphConv.forward
    ref = adj @ (x @ W) + b
    assert out.shape == ref.shape
    max_err = float(jnp.max(jnp.abs(out - ref)))
    assert max_err < 5e-2, f"mismatch vs f32 reference, max abs err {max_err}"
    print("KERNEL_OK")
</pallas_src>

<mosaic_0001>
module attributes {stable_mosaic.version = 11 : i64} {
  func.func @_xw_kernel(%arg0: i32, %arg1: memref<128x32xbf16, #tpu.memory_space<vmem>>, %arg2: memref<32x128xbf16, #tpu.memory_space<vmem>>, %arg3: memref<128x128xbf16, #tpu.memory_space<vmem>>) attributes {dimension_semantics = [#tpu.dimension_semantics<parallel>], iteration_bounds = array<i64: 3>, scalar_prefetch = 0 : i64, scratch_operands = 0 : i64, tpu.core_type = #tpu.core_type<tc>, window_params = [{transform_indices = @transform_0, window_bounds = array<i64: 128, 32>}, {pipeline_mode = #tpu.pipeline_mode<synchronous>, transform_indices = @transform_1, window_bounds = array<i64: 32, 128>}, {transform_indices = @transform_2, window_bounds = array<i64: 128, 128>}]} {
    %c0 = arith.constant 0 : index
    %c0_0 = arith.constant 0 : index
    %0 = vector.load %arg1[%c0, %c0_0] : memref<128x32xbf16, #tpu.memory_space<vmem>>, vector<128x32xbf16>
    %c0_1 = arith.constant 0 : index
    %c0_2 = arith.constant 0 : index
    %1 = vector.load %arg2[%c0_1, %c0_2] : memref<32x128xbf16, #tpu.memory_space<vmem>>, vector<32x128xbf16>
    %cst = arith.constant dense<0.000000e+00> : vector<128x128xf32>
    %2 = tpu.matmul %0, %1, %cst {dimension_numbers = #tpu.dot_dimension_numbers<[1], [0], [0], [1], [0, 0, 1, 1], [], []>} : vector<128x32xbf16>, vector<32x128xbf16>, vector<128x128xf32> -> vector<128x128xf32>
    %3 = arith.truncf %2 : vector<128x128xf32> to vector<128x128xbf16>
    %c0_3 = arith.constant 0 : index
    %c0_4 = arith.constant 0 : index
    %4 = vector.load %arg3[%c0_3, %c0_4] : memref<128x128xbf16, #tpu.memory_space<vmem>>, vector<128x128xbf16>
    tpu.vector_store %arg3[%c0_3, %c0_4], %3 {strides = array<i32>} : memref<128x128xbf16, #tpu.memory_space<vmem>>, vector<128x128xbf16>,
    return
  }
  func.func @transform_0(%arg0: i32) -> (i32, i32) {
    %c0_i32 = arith.constant 0 : i32
    %c0_i32_0 = arith.constant 0 : i32
    return %arg0, %c0_i32 : i32, i32
  }
  func.func @transform_1(%arg0: i32) -> (i32, i32) {
    %c0_i32 = arith.constant 0 : i32
    %c0_i32_0 = arith.constant 0 : i32
    %c0_i32_1 = arith.constant 0 : i32
    return %c0_i32, %c0_i32_0 : i32, i32
  }
  func.func @transform_2(%arg0: i32) -> (i32, i32) {
    %c0_i32 = arith.constant 0 : i32
    %c0_i32_0 = arith.constant 0 : i32
    return %arg0, %c0_i32 : i32, i32
  }
}

</mosaic_0001>

<bundles_post_ra>
// kernel: tpu_custom_call.1
= control target key start
LH: loop header
LB: loop body
LE: loop exit
PB: predicated region body
PF: predicated region fallthrough
CT: control target
= control target key end

     0   :  { %7 = vsyncpa [#allocation3], 0  ;;  %s893_s0 = inlined_call_operand.vmem [shape: bf16[384,32], index: 0, kind: input, shape index: {}]   ;;  %s894_s1 = inlined_call_operand.vmem [shape: bf16[32,128], index: 1, kind: input, shape index: {}]   ;;  %s895_s2 = inlined_call_operand.hbm [shape: bf16[384,128], index: 2, kind: output, shape index: {}]  }
   0x1   :  { %9 = vsyncpa [#allocation3 + $0x1], 0  ;;  %s773_s9 = smov 0   ;;  %s775_s10 = smov 0  }
   0x2   :  { %s777_s11 = smov 0   ;;  %s779_s12 = smov 0  }
   0x3 LB: > { %s794_s13 = sadd.s32 4294967295, %s753_s12   ;;  %s496_s14 = sadd.s32 4294967294, %s753_s12   ;;  %s753_s12 = sphi %s779_s12, %s901_s12   ;;  %s749_s11 = sphi %s777_s11, %s900_s11   ;;  %s745_s10 = sphi %s775_s10, %s899_s10   ;;  %s741_s9 = sphi %s773_s9, %s898_s9  }
   0x4   : > { %s798_s15 = sadd.s32 1, %s753_s12   ;;  %s69_s16 = sadd.s32 1, %s749_s11 }
   0x5   : > { %s66_s17 = ssub.s32 %s753_s12, %s798_s15  ;;  %p79_p0 = scmp.ne.s32.totalorder %s749_s11, %s745_s10 }
   0x6   : > { %p67_p1 = scmp.eq.s32.totalorder %s66_s17, 0  ;;  %p80_p2 = scmp.eq.s32.totalorder %s794_s13, 2 }
   0x7   : > { %p85_p3 = scmp.ne.s32.totalorder %s745_s10, %s741_s9  ;;  %p86_p4 = scmp.eq.s32.totalorder %s496_s14, 2 }
   0x8   : > { %s809_s18 = scalar_select %p67_p1, %s749_s11, %s69_s16  }
   0x9   : > { %p811_p5 = por %p80_p2, %p79_p0  ;;  %p815_p6 = por %p86_p4, %p85_p3 }
   0xa   : > { %p499_p7 = scmp.ge.s32.totalorder %s753_s12, 1  ;;  %p116_p8 = scmp.lt.s32.totalorder %s753_s12, 4 }
   0xc   : > { %p117_p9 = pnand %p499_p7, %p116_p8 }
   0xd   : > { %v681_v0 = vld [vmem:[%s894_s1] sm:$0xff] (!%p117_p9)   ;;  %s501_s23 = sshll.u32 (!%p117_p9), %s794_s13, 4  ;;  %v682_v1 = vld [vmem:[%s894_s1 + $0x8] sm:$0xff] (!%p117_p9)   ;;  %vm218_vm0 = vcmask (!%p117_p9), 261120   ;;  %s135_s30 = sand.u32 (!%p117_p9), 1, %s745_s10  }
   0xe   : > { %120 = sbr.rel (%p117_p9) target bundleno = 267 (0x10b), region = 28  ;;  %p139_p10 = scmp.lt.s32.totalorder (!%p117_p9), %s501_s23, 47  ;;  %616 = vmatprep.subr.bf16.mxu0 (!%p117_p9), %v681_v0  ;;  %636 = vmatprep.subr.bf16.mxu1 (!%p117_p9), %v681_v0 }
   0xf   : > { %617 = vmatpush3.bf16.msra.mxu0 (!%p117_p9), %v681_v0  ;;  %638 = vmatpush3.bf16.msra.mxu1 (!%p117_p9), %v681_v0  ;;  %s500_s3 = sshll.u32 (!%p117_p9), %s135_s30, 6  ;;  %s558_s5 = sshll.u32 (!%p117_p9), %s794_s13, 10 }
  0x10   : > { %618 = vmatprep.subr.bf16.mxu0 (!%p117_p9), %v682_v1  ;;  %637 = vmatprep.subr.bf16.mxu1 (!%p117_p9), %v682_v1  ;;  %s137_s4 = scalar_lea.vmem (!%p117_p9), [#allocation2], %s500_s3  ;;  %s846_s14 = scalar_lea.hbm (!%p117_p9), %s895_s2, %s558_s5 }
  0x11   : > { %s434_s6 = sshll.u32 (!%p117_p9), %s137_s4, 4  ;;  %s852_s13 = scalar_lea.sflag (!%p117_p9), [#allocation3], %s135_s30  ;;  %s848_s6 = int_to_ptr.vmem [resolvable:$true] %s434_s6 }
  0x12   : > { %s691_s16 = scalar_lea.vmem (!%p117_p9), %s848_s6, 1024  ;;  %s755_s17 = smov (!%p117_p9), [#allocation2]  }
  0x13   : > { %619 = vmatpush3.bf16.msra.mxu0 (!%p117_p9), %v682_v1  ;;  %639 = vmatpush3.bf16.msra.mxu1 (!%p117_p9), %v682_v1  ;;  %p692_p11 = scmp.ne.s32.totalorder (!%p117_p9), %s848_s6, %s691_s16  ;;  %s695_s21 = sshll.u32 (!%p117_p9), %s755_s17, 4  ;;  %s696_s21 = int_to_ptr.vmem [resolvable:$false] %s695_s21 }
  0x14   : > { %s697_s22 = scalar_lea.vmem (!%p117_p9), %s696_s21, 2048  ;;  %p698_p0 = scmp.lt.s32.totalorder (!%p117_p9), %s848_s6, %s696_s21 }
  0x15   : > { %s903_s23 = smov (!%p139_p10, %s501_s23), 47  ;;  %p693_p12 = pnand %p692_p11, %p811_p5 }
  0x16   : > { %s502_s26 = sshll.u32 %s903_s23, 2  ;;  %p699_p1 = scmp.lt.s32.totalorder %s697_s22, %s691_s16 }
  0x17   : > { %s142_s29 = scalar_lea.vmem %s893_s0, %s502_s26  ;;  %p694_p13 = pneg %p693_p12 }
  0x18   : > { %v683_v2 = vld [vmem:[%s142_s29] sm:$0xff]   ;;  %v685_v4 = vld [vmem:[%s142_s29 + $0x8] sm:$0xff]   ;;  %v687_v6 = vld [vmem:[%s142_s29 + $0x10] sm:$0xff]   ;;  %p700_p2 = por %p699_p1, %p698_p0 }
  0x19   : > { %v684_v3 = vld [vmem:[%s142_s29 + $0x20] sm:$0xff]   ;;  %620 = vmatprep.mubr.msk.bf16.mxu0 %vm218_vm0, %v683_v2  ;;  %v686_v5 = vld [vmem:[%s142_s29 + $0x28] sm:$0xff]   ;;  %v688_v7 = vld [vmem:[%s142_s29 + $0x30] sm:$0xff]  }
  0x1a   : > { %628 = vmatprep.mubr.msk.bf16.mxu1 %vm218_vm0, %v684_v3  ;;  %621 = vmatmul.mubr.msk.bf16.vlgmr.msra.gmra.mrb[0].mxu0 %vm218_vm0, %v685_v4  ;;  %v689_v8 = vld [vmem:[%s142_s29 + $0x18] sm:$0xff]   ;;  %p701_p3 = pnand %p700_p2, %p694_p13 }
  0x1b   : > { %629 = vmatmul.mubr.msk.bf16.vlgmr.msra.gmra.mrb[0].mxu1 %vm218_vm0, %v686_v5  ;;  %624 = vmatprep.mubr.msk.bf16.mxu0 %vm218_vm0, %v687_v6  ;;  %v690_v9 = vld [vmem:[%s142_s29 + $0x38] sm:$0xff]  }
  0x1c   : > { %632 = vmatprep.mubr.msk.bf16.mxu1 %vm218_vm0, %v688_v7 }
  0x22   : > { %625 = vmatmul.mubr.msk.bf16.gmra.mrb[4].mxu0 %vm218_vm0, %v689_v8 }
  0x23   : > { %633 = vmatmul.mubr.msk.bf16.gmra.mrb[4].mxu1 %vm218_vm0, %v690_v9 }
  0xed   : > { %v622_v10 = vpop.f32.mrb[0].mxu0 }
  0xee   : > { %v630_v11 = vpop.f32.mrb[0].mxu1  ;;  %v277_v12 = vpop.f32.mrb[1].mxu0 }
  0xef   : > { %v309_v13 = vpop.f32.mrb[1].mxu1  ;;  %v623_v14 = vpop.f32.mrb[2].mxu0 }
  0xf0   : > { %v567_v15 = vpack.c.bf16 %v623_v14, %v622_v10  ;;  %v631_v16 = vpop.f32.mrb[2].mxu1  ;;  %v280_v17 = vpop.f32.mrb[3].mxu0 }
  0xf1   : > { %v587_v18 = vpack.c.bf16 %v631_v16, %v630_v11  ;;  %v562_v19 = vpack.c.bf16 %v280_v17, %v277_v12  ;;  %v312_v20 = vpop.f32.mrb[3].mxu1 }
  0xf2   : > { %599 = vst [vmem:[%s137_s4 + $0x8] sm:$0xff] %v567_v15   ;;  %v582_v21 = vpack.c.bf16 %v312_v20, %v309_v13 }
  0xf3   : > { %603 = vst [vmem:[%s137_s4 + $0x28] sm:$0xff] %v587_v18   ;;  %563 = vst [vmem:[%s137_s4] sm:$0xff] %v562_v19  }
  0xf4   : > { %602 = vst [vmem:[%s137_s4 + $0x20] sm:$0xff] %v582_v21  }
  0xf5   : > { %v626_v22 = vpop.f32.mrb[4].mxu0 }
  0xf6   : > { %v634_v23 = vpop.f32.mrb[4].mxu1  ;;  %v293_v24 = vpop.f32.mrb[5].mxu0 }
  0xf7   : > { %v325_v25 = vpop.f32.mrb[5].mxu1  ;;  %v627_v26 = vpop.f32.mrb[6].mxu0 }
  0xf8   : > { %v577_v27 = vpack.c.bf16 %v627_v26, %v626_v22  ;;  %v635_v28 = vpop.f32.mrb[6].mxu1  ;;  %v296_v29 = vpop.f32.mrb[7].mxu0 }
  0xf9   : > { %v597_v30 = vpack.c.bf16 %v635_v28, %v634_v23  ;;  %v572_v31 = vpack.c.bf16 %v296_v29, %v293_v24  ;;  %v328_v32 = vpop.f32.mrb[7].mxu1 }
  0xfa   : > { %601 = vst [vmem:[%s137_s4 + $0x18] sm:$0xff] %v577_v27   ;;  %v592_v33 = vpack.c.bf16 %v328_v32, %v325_v25 }
  0xfb   : > { %605 = vst [vmem:[%s137_s4 + $0x38] sm:$0xff] %v597_v30   ;;  %600 = vst [vmem:[%s137_s4 + $0x10] sm:$0xff] %v572_v31  }
  0xfc   : > { %604 = vst [vmem:[%s137_s4 + $0x30] sm:$0xff] %v592_v33  }
  0xfd   : > { %704 = shalt.err (!%p701_p3)
}
  0xfe   : > { %s705_s23 = scalar_lea.hbm %s846_s14, 1024  ;;  %s709_s26 = scalar_lea.hbm %s895_s2, 3072 }
  0xff   : > { %p706_p4 = scmp.ne.s32.totalorder %s846_s14, %s705_s23  ;;  %p710_p9 = scmp.lt.u32.totalorder %s846_s14, %s895_s2 }
 0x100   : > { %p711_p10 = scmp.lt.u32.totalorder %s709_s26, %s705_s23  ;;  %p713_p12 = scmp.lt.u32.totalorder %s705_s23, %s846_s14 }
 0x101   : > { %p707_p7 = pnand %p706_p4, %p811_p5 }
 0x102   : > { %p712_p11 = por %p711_p10, %p710_p9 }
 0x103   : > { %p708_p8 = pneg %p707_p7 }
 0x104   : > { %p714_p13 = por %p713_p12, %p712_p11 }
 0x106   : > { %p715_p0 = pnand %p714_p13, %p708_p8 }
 0x108   : > { %718 = shalt.err (!%p715_p0)
}
 0x109   : > { %s756_s29 = smov 64   ;;  %s757_s30 = smov 4  }
 0x10a   : > { %640 = dma.vmem_to_hbm [thread:$0]  (%p811_p5), %s848_s6, 1024, %s846_s14, %s852_s13, %s756_s29, %s756_s29, %s757_s30  }
 0x10b PF: > { %p646_p1 = scmp.ge.s32.totalorder %s753_s12, 2  ;;  %s449_s3 = sand.u32 1, %s741_s9  }
 0x10c   : > { %s450_s4 = scalar_lea.sflag [#allocation3], %s449_s3 }
 0x10d   : > { %p643_p2 = pnand %p646_p1, %p815_p6 }
 0x10f   : > { %736 = dma.done.wait (!%p643_p2), %s450_s4, 1024  }
 0x110   : > { %738 = vsyncadd (!%p643_p2), %s450_s4, 4294966272  ;;  %p12_p3 = scmp.ge.s32.totalorder %s798_s15, 5   ;;  %s898_s9 = smov %s745_s10 }
 0x111   : > { %s899_s10 = smov %s749_s11  ;;  %s900_s11 = smov %s809_s18 }
 0x112   : > { %s901_s12 = smov %s798_s15  ;;  %14 = sbr.rel (!%p12_p3) target bundleno = 3 (0x3), region = 63 }
 0x119   :  { %455 = vsyncpa [#allocation3], 1 }
 0x11a   :  { %457 = vsyncpa [#allocation3 + $0x1], 1 }

</bundles_post_ra>
